<compile_context>
chip_gen: v7x
topology: tpu7x:2x2x1
jax: 0.10.0
libtpu: 0.0.40
codegen_flags: <defaults>
</compile_context>

<pallas_src>
import jax
import jax.numpy as jnp
import numpy as np
from jax import lax
from jax.experimental import pallas as pl
from jax.experimental.pallas import tpu as pltpu


def _round_up(x: int, m: int) -> int:
    return ((x + m - 1) // m) * m


def _cdiv(a: int, b: int) -> int:
    return (a + b - 1) // b


def _make_kernel(tn: int, tl: int, sub: int, d: int,
                 chunks_per_split: int, ignore_index: int):
    """Fused dice+bce per-row partial-sum kernel for one (tn, tl) block."""

    def kernel(pred_ref, tgt_ref, out_ref,
               acc_inter, acc_psq, acc_t, acc_bce, acc_valid):
        s_id = pl.program_id(0)          # lane-range split (parallel)
        k = pl.program_id(2)             # chunk within this split (arbitrary)

        @pl.when(k == 0)
        def _():
            acc_inter[...] = jnp.zeros_like(acc_inter)
            acc_psq[...] = jnp.zeros_like(acc_psq)
            acc_t[...] = jnp.zeros_like(acc_t)
            acc_bce[...] = jnp.zeros_like(acc_bce)
            acc_valid[...] = jnp.zeros_like(acc_valid)

        # Logical (unclamped) chunk id -> global column base.  For the
        # redundant tail iteration of an uneven split, base_col >= d, so the
        # lane mask below zeroes every contribution from this step.
        base_col = (s_id * chunks_per_split + k) * tl

        # Static sub-slice loop: big DMA block, small compute temporaries.
        for c0 in range(0, tl, sub):
            cw = min(sub, tl - c0)                       # multiple of 128
            x = pred_ref[:, c0:c0 + cw].astype(jnp.float32)
            traw = tgt_ref[:, c0:c0 + cw]                # native int dtype

            gcol = base_col + c0 + lax.broadcasted_iota(jnp.int32, (tn, cw), 1)
            lane_ok = gcol < d                           # in-bounds pixel
            valid = lane_ok & (traw != ignore_index)
            tpos = lane_ok & (traw == 1)                 # fg (implies valid)

            # Shared-exp sigmoid + stable BCE-with-logits (2 EUP transc./elem)
            e = jnp.exp(-jnp.abs(x))
            sig = jnp.where(x >= 0.0, 1.0, e) / (1.0 + e)
            log1pe = jnp.log1p(e)
            bce = jnp.maximum(x, 0.0) - jnp.where(tpos, x, 0.0) + log1pe

            # Selects (not mask multiplies): exact zeros for masked / garbage
            # lanes (NaN-safe), no float mask temporaries.
            acc_inter[...] += jnp.sum(jnp.where(tpos, sig, 0.0),
                                      axis=-1, keepdims=True)
            acc_psq[...] += jnp.sum(jnp.where(valid, sig * sig, 0.0),
                                    axis=-1, keepdims=True)
            acc_t[...] += jnp.sum(jnp.where(tpos, 1.0, 0.0),
                                  axis=-1, keepdims=True)
            acc_bce[...] += jnp.sum(jnp.where(valid, bce, 0.0),
                                    axis=-1, keepdims=True)
            acc_valid[...] += jnp.sum(jnp.where(valid, 1.0, 0.0),
                                      axis=-1, keepdims=True)

        @pl.when(k == chunks_per_split - 1)
        def _():
            lane = lax.broadcasted_iota(jnp.int32, (tn, 128), 1)
            out_ref[...] = (
                jnp.where(lane == 0, acc_inter[...], 0.0)
                + jnp.where(lane == 1, acc_psq[...], 0.0)
                + jnp.where(lane == 2, acc_t[...], 0.0)
                + jnp.where(lane == 3, acc_bce[...], 0.0)
                + jnp.where(lane == 4, acc_valid[...], 0.0))

    return kernel


def combined_bce_dice_loss_pallas(prediction, target_seg, *,
                                  dice_weight: float = 1.0,
                                  bce_weight: float = 1.0,
                                  reduction: str = "sum",
                                  eps: float = 1e-8,
                                  ignore_index: int = 255,
                                  return_components: bool = False,
                                  max_lane_tile: int = 32 * 1024,
                                  sub_lane_tile: int = 4096):
    """Pallas TPU implementation of CombinedBCEDiceLoss.forward (scalar loss)."""
    if prediction.ndim == 4 and prediction.shape[1] == 1:
        prediction = jnp.squeeze(prediction, axis=1)
    if target_seg.ndim == 4 and target_seg.shape[1] == 1:
        target_seg = jnp.squeeze(target_seg, axis=1)

    n, h, w = target_seg.shape
    d = h * w
    rows = n

    pred = prediction.reshape(rows, d)
    if pred.dtype not in (jnp.float32, jnp.bfloat16, jnp.float16):
        pred = pred.astype(jnp.float32)
    # Target streams in its native dtype (no standalone narrowing cast pass;
    # sentinels like -1 / -100 keep their values and are NOT treated as 255).
    tgt = target_seg.reshape(rows, d)

    # --- tiling --------------------------------------------------------------
    LANE = 128
    TL = min(max_lane_tile, _round_up(d, LANE))
    n_chunks = _cdiv(d, TL)

    if rows < 8:
        TN = rows                          # full-extent row block (legal)
    elif rows % 32 == 0:
        TN = 32
    elif rows % 16 == 0:
        TN = 16
    else:
        TN = 8                             # last row block may be ragged
    row_blocks = _cdiv(rows, TN)
    rows_p = row_blocks * TN

    # Leading 'parallel' split of the lane-chunk range: real 2-TC sharding on
    # v7x, a cheap outer loop on single-TC v5e/v6e.
    SPLIT = 2 if n_chunks >= 2 else 1
    cps = _cdiv(n_chunks, SPLIT)

    if SPLIT * cps == n_chunks:
        def lane_block(s, k):
            return s * cps + k
    else:
        # Uneven split: clamp the DMA to the last real chunk; the in-kernel
        # global-column mask zeroes the redundant iteration's contribution.
        def lane_block(s, k):
            return jnp.minimum(s * cps + k, n_chunks - 1)

    def io_index(s, i, k):
        return (i, lane_block(s, k))

    grid = (SPLIT, row_blocks, cps)

    io_bytes = 2 * TN * TL * (pred.dtype.itemsize + tgt.dtype.itemsize)
    vmem_limit = max(32 * 1024 * 1024,
                     min(int(io_bytes) + 24 * 1024 * 1024, 56 * 1024 * 1024))

    out = pl.pallas_call(
        _make_kernel(TN, TL, sub_lane_tile, d, cps, ignore_index),
        out_shape=jax.ShapeDtypeStruct((SPLIT, rows_p, 128), jnp.float32),
        grid=grid,
        in_specs=[
            pl.BlockSpec((TN, TL), io_index),
            pl.BlockSpec((TN, TL), io_index),
        ],
        out_specs=pl.BlockSpec((None, TN, 128), lambda s, i, k: (s, i, 0)),
        scratch_shapes=[pltpu.VMEM((TN, 1), jnp.float32)] * 5,
        compiler_params=pltpu.CompilerParams(
            dimension_semantics=("parallel", "parallel", "arbitrary"),
            vmem_limit_bytes=vmem_limit),
        cost_estimate=pl.CostEstimate(
            flops=25 * rows * d,
            transcendentals=2 * rows * d,
            bytes_accessed=int(rows * d * (pred.dtype.itemsize
                                           + tgt.dtype.itemsize)
                               + SPLIT * rows_p * 128 * 4)),
    )(pred, tgt)

    # --- tiny finalize in plain XLA ------------------------------------------
    stats = out.sum(axis=0)[:rows]          # sum core-split partials; drop pad rows
    inter = stats[:, 0]
    psq = stats[:, 1]
    tsum = stats[:, 2]
    bsum = stats[:, 3]
    vcnt = stats[:, 4]

    dice_per_row = 1.0 - 2.0 * inter / jnp.maximum(psq + tsum, eps)

    if reduction == "sum":
        dice = dice_per_row.sum() / n
        bce = (bsum / jnp.maximum(vcnt, eps)).sum() / n
    elif reduction == "mean":
        dice = dice_per_row.mean()
        bce = bsum.sum() / jnp.maximum(vcnt.sum(), eps)
    else:
        # TODO(synk): reduction='none' (per-row dice + per-pixel BCE map) is not
        # supported by this fused scalar-loss kernel.
        raise NotImplementedError("reduction must be 'sum' or 'mean'")

    total = dice_weight * dice + bce_weight * bce
    if return_components:
        return total, dice, bce
    return total


def combined_bce_dice_loss_ref(prediction, target_seg, dice_weight=1.0,
                               bce_weight=1.0, reduction="sum", eps=1e-8,
                               ignore_index=255):
    """Pure-JAX reference mirroring the PyTorch CombinedBCEDiceLoss.forward."""
    if prediction.ndim == 4 and prediction.shape[1] == 1:
        prediction = jnp.squeeze(prediction, axis=1)
    if target_seg.ndim == 4 and target_seg.shape[1] == 1:
        target_seg = jnp.squeeze(target_seg, axis=1)
    n, h, w = target_seg.shape
    pred = prediction.reshape(-1, h * w).astype(jnp.float32)
    traw = target_seg.reshape(-1, h * w)
    valid = (traw != ignore_index).astype(jnp.float32)
    t = (traw == 1).astype(jnp.float32)

    # weighted_dice_loss (weighted_val=1.0)
    p = jax.nn.sigmoid(pred) * valid
    tm = t * valid
    inter = (tm * p).sum(-1)
    denom = (p ** 2).sum(-1) + (tm ** 2).sum(-1)
    dice_row = 1.0 - 2.0 * inter / jnp.maximum(denom, eps)

    # weighted_bce_loss (weighted_val=1.0), stable BCE-with-logits
    bce = (jnp.maximum(pred, 0.0) - pred * t
           + jnp.log1p(jnp.exp(-jnp.abs(pred)))) * valid

    if reduction == "sum":
        dice = dice_row.sum() / n
        bce_l = (bce.sum(-1) / jnp.maximum(valid.sum(-1), eps)).sum() / n
    elif reduction == "mean":
        dice = dice_row.mean()
        bce_l = bce.sum() / jnp.maximum(valid.sum(), eps)
    else:
        raise NotImplementedError
    return dice_weight * dice + bce_weight * bce_l


if __name__ == "__main__":
    key = jax.random.PRNGKey(0)

    # --- primary case: CombinedBCEDiceLoss() defaults --------------------------
    k_pred, k_tgt = jax.random.split(key)
    N, H, W = 2, 16, 16
    prediction = jax.random.normal(k_pred, (N, H, W), dtype=jnp.float32)
    target = jax.random.randint(k_tgt, (N, H, W), 0, 3).astype(jnp.int32)
    target = target.at[:, :4, :4].set(255)        # ignore_index patch

    loss = combined_bce_dice_loss_pallas(prediction, target,
                                         dice_weight=1.0, bce_weight=1.0,
                                         reduction="sum", ignore_index=255)
    loss = jax.block_until_ready(loss)
    ref = combined_bce_dice_loss_ref(prediction, target,
                                     dice_weight=1.0, bce_weight=1.0,
                                     reduction="sum", ignore_index=255)
    np.testing.assert_allclose(np.asarray(loss), np.asarray(ref),
                               rtol=1e-5, atol=1e-5)

    # --- second case: exercises the 2-way lane split + multi-chunk accumulation
    #     + the in-block sub-slice loop (small tiles forced via the knobs).
    k_pred2, k_tgt2 = jax.random.split(jax.random.PRNGKey(1))
    N2, H2, W2 = 8, 32, 32
    prediction2 = jax.random.normal(k_pred2, (N2, H2, W2), dtype=jnp.float32)
    target2 = jax.random.randint(k_tgt2, (N2, H2, W2), 0, 3).astype(jnp.int32)
    target2 = target2.at[:, :5, :7].set(255)

    loss2 = combined_bce_dice_loss_pallas(prediction2, target2,
                                          dice_weight=1.0, bce_weight=1.0,
                                          reduction="sum", ignore_index=255,
                                          max_lane_tile=256, sub_lane_tile=128)
    loss2 = jax.block_until_ready(loss2)
    ref2 = combined_bce_dice_loss_ref(prediction2, target2,
                                      dice_weight=1.0, bce_weight=1.0,
                                      reduction="sum", ignore_index=255)
    np.testing.assert_allclose(np.asarray(loss2), np.asarray(ref2),
                               rtol=1e-5, atol=1e-5)

    print("KERNEL_OK")
</pallas_src>

<mosaic_0001>
module attributes {stable_mosaic.version = 11 : i64} {
  func.func @kernel(%arg0: i32, %arg1: i32, %arg2: i32, %arg3: memref<2x256xf32, #tpu.memory_space<vmem>>, %arg4: memref<2x256xi32, #tpu.memory_space<vmem>>, %arg5: memref<1x2x128xf32, #tpu.memory_space<vmem>>, %arg6: memref<2x1xf32, #tpu.memory_space<vmem>>, %arg7: memref<2x1xf32, #tpu.memory_space<vmem>>, %arg8: memref<2x1xf32, #tpu.memory_space<vmem>>, %arg9: memref<2x1xf32, #tpu.memory_space<vmem>>, %arg10: memref<2x1xf32, #tpu.memory_space<vmem>>) attributes {dimension_semantics = [#tpu.dimension_semantics<parallel>, #tpu.dimension_semantics<parallel>, #tpu.dimension_semantics<arbitrary>], iteration_bounds = array<i64: 1, 1, 1>, scalar_prefetch = 0 : i64, scratch_operands = 5 : i64, tpu.core_type = #tpu.core_type<tc>, window_params = [{transform_indices = @transform_0, window_bounds = array<i64: 2, 256>}, {transform_indices = @transform_1, window_bounds = array<i64: 2, 256>}, {transform_indices = @transform_2, window_bounds = array<i64: 1, 2, 128>}]} {
    %c0_i32 = arith.constant 0 : i32
    %0 = arith.cmpi eq, %arg2, %c0_i32 : i32
    %1 = arith.extui %0 : i1 to i32
    %c0_i32_0 = arith.constant 0 : i32
    %2 = arith.cmpi ne, %1, %c0_i32_0 : i32
    scf.if %2 {
      %cst_46 = arith.constant 0.000000e+00 : f32
      %79 = vector.broadcast %cst_46 : f32 to vector<2x1xf32>
      %c0_47 = arith.constant 0 : index
      %c0_48 = arith.constant 0 : index
      %80 = vector.load %arg6[%c0_47, %c0_48] : memref<2x1xf32, #tpu.memory_space<vmem>>, vector<2x1xf32>
      tpu.vector_store %arg6[%c0_47, %c0_48], %79 {strides = array<i32>} : memref<2x1xf32, #tpu.memory_space<vmem>>, vector<2x1xf32>,
      %cst_49 = arith.constant 0.000000e+00 : f32
      %81 = vector.broadcast %cst_49 : f32 to vector<2x1xf32>
      %c0_50 = arith.constant 0 : index
      %c0_51 = arith.constant 0 : index
      %82 = vector.load %arg7[%c0_50, %c0_51] : memref<2x1xf32, #tpu.memory_space<vmem>>, vector<2x1xf32>
      tpu.vector_store %arg7[%c0_50, %c0_51], %81 {strides = array<i32>} : memref<2x1xf32, #tpu.memory_space<vmem>>, vector<2x1xf32>,
      %cst_52 = arith.constant 0.000000e+00 : f32
      %83 = vector.broadcast %cst_52 : f32 to vector<2x1xf32>
      %c0_53 = arith.constant 0 : index
      %c0_54 = arith.constant 0 : index
      %84 = vector.load %arg8[%c0_53, %c0_54] : memref<2x1xf32, #tpu.memory_space<vmem>>, vector<2x1xf32>
      tpu.vector_store %arg8[%c0_53, %c0_54], %83 {strides = array<i32>} : memref<2x1xf32, #tpu.memory_space<vmem>>, vector<2x1xf32>,
      %cst_55 = arith.constant 0.000000e+00 : f32
      %85 = vector.broadcast %cst_55 : f32 to vector<2x1xf32>
      %c0_56 = arith.constant 0 : index
      %c0_57 = arith.constant 0 : index
      %86 = vector.load %arg9[%c0_56, %c0_57] : memref<2x1xf32, #tpu.memory_space<vmem>>, vector<2x1xf32>
      tpu.vector_store %arg9[%c0_56, %c0_57], %85 {strides = array<i32>} : memref<2x1xf32, #tpu.memory_space<vmem>>, vector<2x1xf32>,
      %cst_58 = arith.constant 0.000000e+00 : f32
      %87 = vector.broadcast %cst_58 : f32 to vector<2x1xf32>
      %c0_59 = arith.constant 0 : index
      %c0_60 = arith.constant 0 : index
      %88 = vector.load %arg10[%c0_59, %c0_60] : memref<2x1xf32, #tpu.memory_space<vmem>>, vector<2x1xf32>
      tpu.vector_store %arg10[%c0_59, %c0_60], %87 {strides = array<i32>} : memref<2x1xf32, #tpu.memory_space<vmem>>, vector<2x1xf32>,
    } else {
    }
    %c1_i32 = arith.constant 1 : i32
    %3 = arith.muli %arg0, %c1_i32 : i32
    %4 = arith.addi %3, %arg2 : i32
    %c256_i32 = arith.constant 256 : i32
    %5 = arith.muli %4, %c256_i32 : i32
    %c0 = arith.constant 0 : index
    %c0_1 = arith.constant 0 : index
    %6 = vector.load %arg3[%c0, %c0_1] : memref<2x256xf32, #tpu.memory_space<vmem>>, vector<2x256xf32>
    %c0_2 = arith.constant 0 : index
    %c0_3 = arith.constant 0 : index
    %7 = vector.load %arg4[%c0_2, %c0_3] : memref<2x256xi32, #tpu.memory_space<vmem>>, vector<2x256xi32>
    %c0_i32_4 = arith.constant 0 : i32
    %8 = arith.addi %5, %c0_i32_4 : i32
    %9 = tpu.iota {dimensions = array<i32: 1>} : vector<2x256xi32>
    %10 = vector.broadcast %8 : i32 to vector<2x256xi32>
    %11 = arith.addi %10, %9 : vector<2x256xi32>
    %c256_i32_5 = arith.constant 256 : i32
    %12 = vector.broadcast %c256_i32_5 : i32 to vector<2x256xi32>
    %13 = arith.cmpi slt, %11, %12 : vector<2x256xi32>
    %c255_i32 = arith.constant 255 : i32
    %14 = vector.broadcast %c255_i32 : i32 to vector<2x256xi32>
    %15 = arith.cmpi ne, %7, %14 : vector<2x256xi32>
    %16 = arith.andi %13, %15 : vector<2x256xi1>
    %c1_i32_6 = arith.constant 1 : i32
    %17 = vector.broadcast %c1_i32_6 : i32 to vector<2x256xi32>
    %18 = arith.cmpi eq, %7, %17 : vector<2x256xi32>
    %19 = arith.andi %13, %18 : vector<2x256xi1>
    %20 = math.absf %6 : vector<2x256xf32>
    %cst = arith.constant 0.000000e+00 : f32
    %21 = vector.broadcast %cst : f32 to vector<2x256xf32>
    %22 = arith.subf %21, %20 : vector<2x256xf32>
    %23 = math.exp %22 : vector<2x256xf32>
    %cst_7 = arith.constant 0.000000e+00 : f32
    %24 = vector.broadcast %cst_7 : f32 to vector<2x256xf32>
    %25 = arith.cmpf oge, %6, %24 : vector<2x256xf32>
    %cst_8 = arith.constant 1.000000e+00 : f32
    %26 = vector.broadcast %cst_8 : f32 to vector<2x256xf32>
    %27 = arith.select %25, %26, %23 : vector<2x256xi1>, vector<2x256xf32>
    %cst_9 = arith.constant 1.000000e+00 : f32
    %28 = vector.broadcast %cst_9 : f32 to vector<2x256xf32>
    %29 = arith.addf %28, %23 : vector<2x256xf32>
    %30 = arith.divf %27, %29 : vector<2x256xf32>
    %31 = math.log1p %23 : vector<2x256xf32>
    %cst_10 = arith.constant 0.000000e+00 : f32
    %32 = vector.broadcast %cst_10 : f32 to vector<2x256xf32>
    %33 = arith.maximumf %6, %32 : vector<2x256xf32>
    %cst_11 = arith.constant 0.000000e+00 : f32
    %34 = vector.broadcast %cst_11 : f32 to vector<2x256xf32>
    %35 = arith.select %19, %6, %34 : vector<2x256xi1>, vector<2x256xf32>
    %36 = arith.subf %33, %35 : vector<2x256xf32>
    %37 = arith.addf %36, %31 : vector<2x256xf32>
    %c0_12 = arith.constant 0 : index
    %c0_13 = arith.constant 0 : index
    %38 = vector.load %arg6[%c0_12, %c0_13] : memref<2x1xf32, #tpu.memory_space<vmem>>, vector<2x1xf32>
    %cst_14 = arith.constant 0.000000e+00 : f32
    %39 = vector.broadcast %cst_14 : f32 to vector<2x256xf32>
    %40 = arith.select %19, %30, %39 : vector<2x256xi1>, vector<2x256xf32>
    %cst_15 = arith.constant dense<0.000000e+00> : vector<2xf32>
    %41 = vector.multi_reduction <add>, %40, %cst_15 [1] : vector<2x256xf32> to vector<2xf32>
    %42 = vector.shape_cast %41 : vector<2xf32> to vector<2x1xf32>
    %43 = arith.addf %38, %42 : vector<2x1xf32>
    %c0_16 = arith.constant 0 : index
    %c0_17 = arith.constant 0 : index
    %44 = vector.load %arg6[%c0_16, %c0_17] : memref<2x1xf32, #tpu.memory_space<vmem>>, vector<2x1xf32>
    tpu.vector_store %arg6[%c0_16, %c0_17], %43 {strides = array<i32>} : memref<2x1xf32, #tpu.memory_space<vmem>>, vector<2x1xf32>,
    %c0_18 = arith.constant 0 : index
    %c0_19 = arith.constant 0 : index
    %45 = vector.load %arg7[%c0_18, %c0_19] : memref<2x1xf32, #tpu.memory_space<vmem>>, vector<2x1xf32>
    %46 = arith.mulf %30, %30 : vector<2x256xf32>
    %cst_20 = arith.constant 0.000000e+00 : f32
    %47 = vector.broadcast %cst_20 : f32 to vector<2x256xf32>
    %48 = arith.select %16, %46, %47 : vector<2x256xi1>, vector<2x256xf32>
    %cst_21 = arith.constant dense<0.000000e+00> : vector<2xf32>
    %49 = vector.multi_reduction <add>, %48, %cst_21 [1] : vector<2x256xf32> to vector<2xf32>
    %50 = vector.shape_cast %49 : vector<2xf32> to vector<2x1xf32>
    %51 = arith.addf %45, %50 : vector<2x1xf32>
    %c0_22 = arith.constant 0 : index
    %c0_23 = arith.constant 0 : index
    %52 = vector.load %arg7[%c0_22, %c0_23] : memref<2x1xf32, #tpu.memory_space<vmem>>, vector<2x1xf32>
    tpu.vector_store %arg7[%c0_22, %c0_23], %51 {strides = array<i32>} : memref<2x1xf32, #tpu.memory_space<vmem>>, vector<2x1xf32>,
    %c0_24 = arith.constant 0 : index
    %c0_25 = arith.constant 0 : index
    %53 = vector.load %arg8[%c0_24, %c0_25] : memref<2x1xf32, #tpu.memory_space<vmem>>, vector<2x1xf32>
    %cst_26 = arith.constant 1.000000e+00 : f32
    %cst_27 = arith.constant 0.000000e+00 : f32
    %54 = vector.broadcast %cst_26 : f32 to vector<2x256xf32>
    %55 = vector.broadcast %cst_27 : f32 to vector<2x256xf32>
    %56 = arith.select %19, %54, %55 : vector<2x256xi1>, vector<2x256xf32>
    %cst_28 = arith.constant dense<0.000000e+00> : vector<2xf32>
    %57 = vector.multi_reduction <add>, %56, %cst_28 [1] : vector<2x256xf32> to vector<2xf32>
    %58 = vector.shape_cast %57 : vector<2xf32> to vector<2x1xf32>
    %59 = arith.addf %53, %58 : vector<2x1xf32>
    %c0_29 = arith.constant 0 : index
    %c0_30 = arith.constant 0 : index
    %60 = vector.load %arg8[%c0_29, %c0_30] : memref<2x1xf32, #tpu.memory_space<vmem>>, vector<2x1xf32>
    tpu.vector_store %arg8[%c0_29, %c0_30], %59 {strides = array<i32>} : memref<2x1xf32, #tpu.memory_space<vmem>>, vector<2x1xf32>,
    %c0_31 = arith.constant 0 : index
    %c0_32 = arith.constant 0 : index
    %61 = vector.load %arg9[%c0_31, %c0_32] : memref<2x1xf32, #tpu.memory_space<vmem>>, vector<2x1xf32>
    %cst_33 = arith.constant 0.000000e+00 : f32
    %62 = vector.broadcast %cst_33 : f32 to vector<2x256xf32>
    %63 = arith.select %16, %37, %62 : vector<2x256xi1>, vector<2x256xf32>
    %cst_34 = arith.constant dense<0.000000e+00> : vector<2xf32>
    %64 = vector.multi_reduction <add>, %63, %cst_34 [1] : vector<2x256xf32> to vector<2xf32>
    %65 = vector.shape_cast %64 : vector<2xf32> to vector<2x1xf32>
    %66 = arith.addf %61, %65 : vector<2x1xf32>
    %c0_35 = arith.constant 0 : index
    %c0_36 = arith.constant 0 : index
    %67 = vector.load %arg9[%c0_35, %c0_36] : memref<2x1xf32, #tpu.memory_space<vmem>>, vector<2x1xf32>
    tpu.vector_store %arg9[%c0_35, %c0_36], %66 {strides = array<i32>} : memref<2x1xf32, #tpu.memory_space<vmem>>, vector<2x1xf32>,
    %c0_37 = arith.constant 0 : index
    %c0_38 = arith.constant 0 : index
    %68 = vector.load %arg10[%c0_37, %c0_38] : memref<2x1xf32, #tpu.memory_space<vmem>>, vector<2x1xf32>
    %cst_39 = arith.constant 1.000000e+00 : f32
    %cst_40 = arith.constant 0.000000e+00 : f32
    %69 = vector.broadcast %cst_39 : f32 to vector<2x256xf32>
    %70 = vector.broadcast %cst_40 : f32 to vector<2x256xf32>
    %71 = arith.select %16, %69, %70 : vector<2x256xi1>, vector<2x256xf32>
    %cst_41 = arith.constant dense<0.000000e+00> : vector<2xf32>
    %72 = vector.multi_reduction <add>, %71, %cst_41 [1] : vector<2x256xf32> to vector<2xf32>
    %73 = vector.shape_cast %72 : vector<2xf32> to vector<2x1xf32>
    %74 = arith.addf %68, %73 : vector<2x1xf32>
    %c0_42 = arith.constant 0 : index
    %c0_43 = arith.constant 0 : index
    %75 = vector.load %arg10[%c0_42, %c0_43] : memref<2x1xf32, #tpu.memory_space<vmem>>, vector<2x1xf32>
    tpu.vector_store %arg10[%c0_42, %c0_43], %74 {strides = array<i32>} : memref<2x1xf32, #tpu.memory_space<vmem>>, vector<2x1xf32>,
    %c0_i32_44 = arith.constant 0 : i32
    %76 = arith.cmpi eq, %arg2, %c0_i32_44 : i32
    %77 = arith.extui %76 : i1 to i32
    %c0_i32_45 = arith.constant 0 : i32
    %78 = arith.cmpi ne, %77, %c0_i32_45 : i32
    scf.if %78 {
      %79 = tpu.iota {dimensions = array<i32: 1>} : vector<2x128xi32>
      %c0_i32_46 = arith.constant 0 : i32
      %80 = vector.broadcast %c0_i32_46 : i32 to vector<2x128xi32>
      %81 = arith.cmpi eq, %79, %80 : vector<2x128xi32>
      %c0_47 = arith.constant 0 : index
      %c0_48 = arith.constant 0 : index
      %82 = vector.load %arg6[%c0_47, %c0_48] : memref<2x1xf32, #tpu.memory_space<vmem>>, vector<2x1xf32>
      %cst_49 = arith.constant 0.000000e+00 : f32
      %83 = vector.shape_cast %82 : vector<2x1xf32> to vector<2x1xf32>
      %84 = vector.broadcast %83 : vector<2x1xf32> to vector<2x128xf32>
      %85 = vector.broadcast %cst_49 : f32 to vector<2x128xf32>
      %86 = arith.select %81, %84, %85 : vector<2x128xi1>, vector<2x128xf32>
      %c1_i32_50 = arith.constant 1 : i32
      %87 = vector.broadcast %c1_i32_50 : i32 to vector<2x128xi32>
      %88 = arith.cmpi eq, %79, %87 : vector<2x128xi32>
      %c0_51 = arith.constant 0 : index
      %c0_52 = arith.constant 0 : index
      %89 = vector.load %arg7[%c0_51, %c0_52] : memref<2x1xf32, #tpu.memory_space<vmem>>, vector<2x1xf32>
      %cst_53 = arith.constant 0.000000e+00 : f32
      %90 = vector.shape_cast %89 : vector<2x1xf32> to vector<2x1xf32>
      %91 = vector.broadcast %90 : vector<2x1xf32> to vector<2x128xf32>
      %92 = vector.broadcast %cst_53 : f32 to vector<2x128xf32>
      %93 = arith.select %88, %91, %92 : vector<2x128xi1>, vector<2x128xf32>
      %94 = arith.addf %86, %93 : vector<2x128xf32>
      %c2_i32 = arith.constant 2 : i32
      %95 = vector.broadcast %c2_i32 : i32 to vector<2x128xi32>
      %96 = arith.cmpi eq, %79, %95 : vector<2x128xi32>
      %c0_54 = arith.constant 0 : index
      %c0_55 = arith.constant 0 : index
      %97 = vector.load %arg8[%c0_54, %c0_55] : memref<2x1xf32, #tpu.memory_space<vmem>>, vector<2x1xf32>
      %cst_56 = arith.constant 0.000000e+00 : f32
      %98 = vector.shape_cast %97 : vector<2x1xf32> to vector<2x1xf32>
      %99 = vector.broadcast %98 : vector<2x1xf32> to vector<2x128xf32>
      %100 = vector.broadcast %cst_56 : f32 to vector<2x128xf32>
      %101 = arith.select %96, %99, %100 : vector<2x128xi1>, vector<2x128xf32>
      %102 = arith.addf %94, %101 : vector<2x128xf32>
      %c3_i32 = arith.constant 3 : i32
      %103 = vector.broadcast %c3_i32 : i32 to vector<2x128xi32>
      %104 = arith.cmpi eq, %79, %103 : vector<2x128xi32>
      %c0_57 = arith.constant 0 : index
      %c0_58 = arith.constant 0 : index
      %105 = vector.load %arg9[%c0_57, %c0_58] : memref<2x1xf32, #tpu.memory_space<vmem>>, vector<2x1xf32>
      %cst_59 = arith.constant 0.000000e+00 : f32
      %106 = vector.shape_cast %105 : vector<2x1xf32> to vector<2x1xf32>
      %107 = vector.broadcast %106 : vector<2x1xf32> to vector<2x128xf32>
      %108 = vector.broadcast %cst_59 : f32 to vector<2x128xf32>
      %109 = arith.select %104, %107, %108 : vector<2x128xi1>, vector<2x128xf32>
      %110 = arith.addf %102, %109 : vector<2x128xf32>
      %c4_i32 = arith.constant 4 : i32
      %111 = vector.broadcast %c4_i32 : i32 to vector<2x128xi32>
      %112 = arith.cmpi eq, %79, %111 : vector<2x128xi32>
      %c0_60 = arith.constant 0 : index
      %c0_61 = arith.constant 0 : index
      %113 = vector.load %arg10[%c0_60, %c0_61] : memref<2x1xf32, #tpu.memory_space<vmem>>, vector<2x1xf32>
      %cst_62 = arith.constant 0.000000e+00 : f32
      %114 = vector.shape_cast %113 : vector<2x1xf32> to vector<2x1xf32>
      %115 = vector.broadcast %114 : vector<2x1xf32> to vector<2x128xf32>
      %116 = vector.broadcast %cst_62 : f32 to vector<2x128xf32>
      %117 = arith.select %112, %115, %116 : vector<2x128xi1>, vector<2x128xf32>
      %118 = arith.addf %110, %117 : vector<2x128xf32>
      %c0_63 = arith.constant 0 : index
      %c0_64 = arith.constant 0 : index
      %c0_65 = arith.constant 0 : index
      %119 = vector.load %arg5[%c0_63, %c0_64, %c0_65] : memref<1x2x128xf32, #tpu.memory_space<vmem>>, vector<1x2x128xf32>
      %120 = vector.shape_cast %119 : vector<1x2x128xf32> to vector<2x128xf32>
      %121 = vector.shape_cast %118 : vector<2x128xf32> to vector<1x2x128xf32>
      tpu.vector_store %arg5[%c0_63, %c0_64, %c0_65], %121 {strides = array<i32>} : memref<1x2x128xf32, #tpu.memory_space<vmem>>, vector<1x2x128xf32>,
    } else {
    }
    return
  }
  func.func @transform_0(%arg0: i32, %arg1: i32, %arg2: i32) -> (i32, i32) {
    %c1_i32 = arith.constant 1 : i32
    %0 = arith.muli %arg0, %c1_i32 : i32
    %1 = arith.addi %0, %arg2 : i32
    %c0_i32 = arith.constant 0 : i32
    return %arg1, %1 : i32, i32
  }
  func.func @transform_1(%arg0: i32, %arg1: i32, %arg2: i32) -> (i32, i32) {
    %c1_i32 = arith.constant 1 : i32
    %0 = arith.muli %arg0, %c1_i32 : i32
    %1 = arith.addi %0, %arg2 : i32
    %c0_i32 = arith.constant 0 : i32
    return %arg1, %1 : i32, i32
  }
  func.func @transform_2(%arg0: i32, %arg1: i32, %arg2: i32) -> (i32, i32, i32) {
    %c0_i32 = arith.constant 0 : i32
    %c0_i32_0 = arith.constant 0 : i32
    return %arg0, %arg1, %c0_i32 : i32, i32, i32
  }
}

</mosaic_0001>

<bundles_post_ra>
// kernel: tpu_custom_call.1
= control target key start
LH: loop header
LB: loop body
LE: loop exit
PB: predicated region body
PF: predicated region fallthrough
CT: control target
= control target key end

     0   :  { %7 = vsyncpa [#allocation8], 0  ;;  %s493_s0 = inlined_call_operand.hbm [shape: f32[2,256], index: 0, kind: input, shape index: {}]   ;;  %s494_s1 = inlined_call_operand.hbm [shape: s32[2,256], index: 1, kind: input, shape index: {}]   ;;  %s495_s2 = inlined_call_operand.hbm [shape: f32[1,2,128], index: 2, kind: output, shape index: {}]  }
   0x1   :  { %8 = vsyncpa [#allocation11], 0 }
   0x2   :  { %9 = vsyncpa [#allocation9], 0  ;;  %s379_s9 = smov [#allocation7]   ;;  %s380_s11 = smov [#allocation10]  }
   0x3   :  { %s20_s10 = sshll.u32 %s379_s9, 4  ;;  %s34_s12 = sshll.u32 %s380_s11, 4  ;;  %s21_s10 = int_to_ptr.vmem [resolvable:$true] %s20_s10  ;;  %s35_s12 = int_to_ptr.vmem [resolvable:$true] %s34_s12 }
   0x4   :  { %s307_s15 = scalar_lea.hbm %s493_s0, 64 }
   0x5   :  { %p308_p0 = scmp.ne.s32.totalorder %s493_s0, %s307_s15  ;;  %p311_p1 = scmp.lt.u32.totalorder %s307_s15, %s493_s0 }
   0x7   :  { %p313_p2 = pnand %p311_p1, %p308_p0 }
   0x9   :  { %316 = shalt.err (!%p313_p2)
}
   0xa   :  { %s317_s20 = scalar_lea.vmem %s21_s10, 64  ;;  %p322_p4 = scmp.lt.s32.totalorder %s21_s10, %s21_s10 }
   0xb   :  { %p318_p3 = scmp.ne.s32.totalorder %s21_s10, %s317_s20  ;;  %p323_p5 = scmp.lt.s32.totalorder %s317_s20, %s317_s20 }
   0xd   :  { %p324_p6 = por %p323_p5, %p322_p4 }
   0xf   :  { %p325_p7 = pnand %p324_p6, %p318_p3 }
  0x11   :  { %328 = shalt.err (!%p325_p7)
}
  0x12   :  { %23 = dma.hbm_to_vmem [thread:$0]  %s493_s0, 64, %s21_s10, [#allocation8]  }
  0x13   :  { %s329_s25 = scalar_lea.hbm %s494_s1, 64 }
  0x14   :  { %p330_p8 = scmp.ne.s32.totalorder %s494_s1, %s329_s25  ;;  %p333_p9 = scmp.lt.u32.totalorder %s329_s25, %s494_s1 }
  0x16   :  { %p335_p10 = pnand %p333_p9, %p330_p8 }
  0x18   :  { %338 = shalt.err (!%p335_p10)
}
  0x19   :  { %s339_s30 = scalar_lea.vmem %s35_s12, 64  ;;  %p344_p12 = scmp.lt.s32.totalorder %s35_s12, %s35_s12 }
  0x1a   :  { %p340_p11 = scmp.ne.s32.totalorder %s35_s12, %s339_s30  ;;  %p345_p13 = scmp.lt.s32.totalorder %s339_s30, %s339_s30 }
  0x1c   :  { %p346_p0 = por %p345_p13, %p344_p12 }
  0x1e   :  { %p347_p1 = pnand %p346_p0, %p340_p11 }
  0x20   :  { %350 = shalt.err (!%p347_p1)
}
  0x21   :  { %37 = dma.hbm_to_vmem [thread:$0]  %s494_s1, 64, %s35_s12, [#allocation11]  }
  0x22   :  { %373 = dma.done.wait [#allocation8], 64  }
  0x23   :  { %374 = vsyncadd [#allocation8], 4294967232 }
  0x24   :  { %375 = dma.done.wait [#allocation11], 64  }
  0x25   :  { %376 = vsyncadd [#allocation11], 4294967232  ;;  %v62_v0 = vlaneseq  ;;  %v381_v1 = vmov 1983009808   ;;  %vm52_vm0 = vcmask 1024   ;;  %v382_v3 = vmov 0  }
  0x26   :  { %v73_v2 = vunpack.c.l.s4 %v381_v1  ;;  %299 = vset.pattern.permute.xlu1 %v382_v3  ;;  %300 = vset.pattern.permute.xlu0 %v382_v3  ;;  %v383_v5 = vmov 0.0   ;;  %v60_v8 = vld [vmem:[#allocation7] sm:$0xf]  ;;  %v61_v9 = vld [vmem:[#allocation10] sm:$0xf]  ;;  %vm157_vm3 = vcmask 1041408  }
  0x27   :  { %v76_v4 = vshrl.u32 %v62_v0, 7  ;;  %53 = vst.msk [vmem:[#allocation2] sm:$0x3] %vm52_vm0, %v383_v5  ;;  %54 = vst.msk [vmem:[#allocation3] sm:$0x3] %vm52_vm0, %v383_v5  ;;  %vm84_vm1 = vcmp.eq.s32.totalorder %v61_v9, 1 }
  0x28   :  { %55 = vst.msk [vmem:[#allocation4] sm:$0x3] %vm52_vm0, %v383_v5  ;;  %56 = vst.msk [vmem:[#allocation5] sm:$0x3] %vm52_vm0, %v383_v5  ;;  %v74_v6 = vunpack.c.0.s8 %v73_v2  ;;  %v98_v10 = vand.u32 2147483647, %v60_v8 }
  0x29   :  { %57 = vst.msk [vmem:[#allocation6] sm:$0x3] %vm52_vm0, %v383_v5  ;;  %v85_v11 = vsel %vm84_vm1, 1, %v382_v3  ;;  %vm70_vm5 = vcmp.ne.s32.totalorder %v61_v9, 255  ;;  %vm102_vm6 = vcmp.ge.f32.partialorder %v60_v8, 0.0  ;;  %v116_v34 = vmax.f32 %v60_v8, 0.0 }
  0x2a   :  { %v77_v7 = vsub.s32 %v74_v6, %v76_v4  ;;  %v99_v13 = vsub.f32 0.0, %v98_v10  ;;  %v71_v30 = vsel %vm70_vm5, 1, %v382_v3  ;;  %s384_s1 = smov [#allocation12]  }
  0x2b   :  { %s283_s4 = sshll.u32 %s384_s1, 4  ;;  %s284_s4 = int_to_ptr.vmem [resolvable:$true] %s283_s4 }
  0x2c   :  { %v92_v12 = vrot.slane %v85_v11, %v77_v7  ;;  %v100_v15 = vmul.f32 1.442695, %v99_v13  ;;  %v124_v22 = vrot.slane %v60_v8, %v77_v7  ;;  %v78_v36 = vrot.slane %v71_v30, %v77_v7  ;;  %s351_s5 = scalar_lea.vmem %s284_s4, 32  ;;  %p356_p3 = scmp.lt.s32.totalorder %s284_s4, %s284_s4 }
  0x2d   :  { %p352_p2 = scmp.ne.s32.totalorder %s284_s4, %s351_s5  ;;  %p357_p4 = scmp.lt.s32.totalorder %s351_s5, %s351_s5 }
  0x2e   :  { %v93_v14 = vcombine.high %v92_v12, %v92_v12  ;;  %vm94_vm2 = vcmp.ne.s32.totalorder %v92_v12, 0  ;;  %301 = vpow2.f32 %v100_v15  ;;  %v125_v23 = vcombine.high %v124_v22, %v124_v22  ;;  %v166_v17 = vld [vmem:[#allocation3] sm:$0x3] }
  0x2f   :  { %v189_v16 = vsel %vm94_vm2, 1.0, %v383_v5  ;;  %v128_v26 = vsel %vm94_vm2, %v124_v22, 0.0  ;;  %v79_v42 = vcombine.high %v78_v36, %v78_v36  ;;  %vm80_vm8 = vcmp.ne.s32.totalorder %v78_v36, 0  ;;  %v188_v11 = vld [vmem:[#allocation4] sm:$0x3]  ;;  %p358_p5 = por %p357_p4, %p356_p3 }
  0x30   :  { %vm437_vm4 = vcmp.ne.s32.totalorder %v93_v14, 0  ;;  %v191_v18 = vsel %vm157_vm3, %v189_v16, 0.0  ;;  %v220_v59 = vsel %vm80_vm8, 1.0, %v383_v5  ;;  %v143_v14 = vld [vmem:[#allocation2] sm:$0x3] }
  0x31   :  { %v190_v19 = vsel %vm437_vm4, 1.0, %v383_v5  ;;  %v129_v27 = vsel %vm437_vm4, %v125_v23, 0.0  ;;  %vm451_vm9 = vcmp.ne.s32.totalorder %v79_v42, 0  ;;  %v219_v23 = vld [vmem:[#allocation6] sm:$0x3]  ;;  %p359_p6 = pnand %p358_p5, %p352_p2 }
  0x32   :  { %v192_v20 = vsel %vm157_vm3, %v190_v19, 0.0  ;;  %v132_v29 = vcombine.low %v128_v26, %v129_v27  ;;  %v221_v60 = vsel %vm451_vm9, 1.0, %v383_v5  ;;  %v222_v5 = vsel %vm157_vm3, %v220_v59, 0.0 }
  0x33   :  { %v193_v21 = vadd.f32 %v192_v20, %v191_v18  ;;  %v223_v8 = vsel %vm157_vm3, %v221_v60, 0.0  ;;  %v198_v18 = vld [vmem:[#allocation5] sm:$0x3] }
  0x34   :  { %v139_v32 = vrot.slane %v132_v29, %v77_v7  ;;  %v224_v10 = vadd.f32 %v223_v8, %v222_v5 }
  0x35   :  { %194 = vadd.xlane.f32.xlu1 %v193_v21 }
  0x36   :  { %v141_v41 = vsub.f32 %v116_v34, %v139_v32 }
  0x38   :  { %v302_v24 = vpop.eup %301 }
  0x39   :  { %v104_v25 = vadd.f32 1.0, %v302_v24  ;;  %v110_v28 = vmul.f32 -0.5, %v302_v24  ;;  %v113_v33 = vand.u32 2147483647, %v302_v24  ;;  %v103_v35 = vsel %vm102_vm6, 1.0, %v302_v24 }
  0x3b   :  { %303 = vrcp.f32 %v104_v25  ;;  %v111_v31 = vadd.f32 1.0, %v110_v28  ;;  %vm114_vm7 = vcmp.lt.f32.partialorder %v113_v33, 0.0004427343 }
  0x3c   :  { %305 = vlog2.f32 %v104_v25 }
  0x3d   :  { %v112_v38 = vmul.f32 %v302_v24, %v111_v31  ;;  %v63_v31 = vand.u32 127, %v62_v0 }
  0x3f   :  { %vm232_vm10 = vcmp.eq.s32.totalorder %v63_v31, 0  ;;  %vm240_vm11 = vcmp.eq.s32.totalorder %v63_v31, 1  ;;  %vm249_vm12 = vcmp.eq.s32.totalorder %v63_v31, 2  ;;  %vm258_vm13 = vcmp.eq.s32.totalorder %v63_v31, 3 }
  0x40   :  { %vm267_vm14 = vcmp.eq.s32.totalorder %v63_v31, 4 }
  0x45   :  { %v304_v37 = vpop.eup %303 }
  0x46   :  { %v306_v39 = vpop.eup %305  ;;  %v106_v40 = vmul.f32 %v304_v37, %v103_v35 }
  0x47   :  { %v109_v43 = vmul.f32 0.6931472, %v306_v39 }
  0x48   :  { %v151_v44 = vrot.slane %v106_v40, %v77_v7  ;;  %v167_v45 = vmul.f32 %v106_v40, %v106_v40 }
  0x49   :  { %v115_v46 = vsel %vm114_vm7, %v112_v38, %v109_v43 }
  0x4a   :  { %v152_v47 = vcombine.high %v151_v44, %v151_v44  ;;  %v155_v48 = vsel %vm94_vm2, %v151_v44, 0.0  ;;  %v175_v49 = vrot.slane %v167_v45, %v77_v7  ;;  %v142_v50 = vadd.f32 %v141_v41, %v115_v46 }
  0x4b   :  { %v158_v51 = vsel %vm157_vm3, %v155_v48, 0.0 }
  0x4c   :  { %v156_v53 = vsel %vm437_vm4, %v152_v47, 0.0  ;;  %v176_v54 = vcombine.high %v175_v49, %v175_v49  ;;  %v179_v55 = vsel %vm80_vm8, %v175_v49, 0.0  ;;  %v206_v56 = vrot.slane %v142_v50, %v77_v7 }
  0x4d   :  { %v159_v57 = vsel %vm157_vm3, %v156_v53, 0.0  ;;  %v181_v58 = vsel %vm157_vm3, %v179_v55, 0.0 }
  0x4e   :  { %v160_v61 = vadd.f32 %v159_v57, %v158_v51  ;;  %v180_v62 = vsel %vm451_vm9, %v176_v54, 0.0  ;;  %v207_v63 = vcombine.high %v206_v56, %v206_v56  ;;  %v210_v1 = vsel %vm80_vm8, %v206_v56, 0.0 }
  0x4f   :  { %v182_v2 = vsel %vm157_vm3, %v180_v62, 0.0  ;;  %v212_v3 = vsel %vm157_vm3, %v210_v1, 0.0 }
  0x50   :  { %161 = vadd.xlane.f32.xlu0 %v160_v61  ;;  %v183_v4 = vadd.f32 %v182_v2, %v181_v58  ;;  %v211_v6 = vsel %vm451_vm9, %v207_v63, 0.0 }
  0x51   :  { %v213_v7 = vsel %vm157_vm3, %v211_v6, 0.0 }
  0x52   :  { %v214_v9 = vadd.f32 %v213_v7, %v212_v3 }
  0x54   :  { %184 = vadd.xlane.f32.xlu0 %v183_v4  ;;  %215 = vadd.xlane.f32.xlu1 %v214_v9 }
  0x58   :  { %225 = vadd.xlane.f32.xlu0 %v224_v10 }
  0xc2   :  { %v195_v12 = vpop.xlane.xlu1 %194 }
  0xc3   :  { %v196_v13 = vadd.f32 %v195_v12, %v188_v11 }
  0xc5   :  { %197 = vst.msk [vmem:[#allocation4] sm:$0x3] %vm52_vm0, %v196_v13 }
  0xcc   :  { %v250_v27 = vld [vmem:[#allocation4] sm:$0x3] }
  0xdd   :  { %v162_v15 = vpop.xlane.xlu0 %161 }
  0xde   :  { %v163_v16 = vadd.f32 %v162_v15, %v143_v14 }
  0xe0   :  { %165 = vst.msk [vmem:[#allocation2] sm:$0x3] %vm52_vm0, %v163_v16 }
  0xe1   :  { %v185_v19 = vpop.xlane.xlu0 %184  ;;  %v216_v20 = vpop.xlane.xlu1 %215 }
  0xe2   :  { %v186_v21 = vadd.f32 %v185_v19, %v166_v17  ;;  %v217_v22 = vadd.f32 %v216_v20, %v198_v18 }
  0xe4   :  { %187 = vst.msk [vmem:[#allocation3] sm:$0x3] %vm52_vm0, %v186_v21  ;;  %218 = vst.msk [vmem:[#allocation5] sm:$0x3] %vm52_vm0, %v217_v22 }
  0xe5   :  { %v226_v24 = vpop.xlane.xlu0 %225 }
  0xe6   :  { %v227_v25 = vadd.f32 %v226_v24, %v219_v23 }
  0xe7   :  { %v233_v26 = vld [vmem:[#allocation2] sm:$0x3] }
  0xe8   :  { %236 = vperm.xlu1 %299, %v233_v26   ;;  %228 = vst.msk [vmem:[#allocation6] sm:$0x3] %vm52_vm0, %v227_v25 }
  0xeb   :  { %v241_v28 = vld [vmem:[#allocation3] sm:$0x3]  ;;  %v259_v29 = vld [vmem:[#allocation5] sm:$0x3] }
  0xec   :  { %244 = vperm.xlu0 %300, %v241_v28   ;;  %253 = vperm.xlu1 %299, %v250_v27  }
  0xef   :  { %v268_v30 = vld [vmem:[#allocation6] sm:$0x3] }
  0xf0   :  { %262 = vperm.xlu1 %299, %v259_v29  }
  0xf4   :  { %271 = vperm.xlu1 %299, %v268_v30  }
 0x167   :  { %v237_v32 = vpop.permute.xlu1 %236 }
 0x168   :  { %v239_v35 = vsel %vm232_vm10, %v237_v32, 0.0 }
 0x16b   :  { %v245_v33 = vpop.permute.xlu0 %244  ;;  %v254_v34 = vpop.permute.xlu1 %253 }
 0x16c   :  { %v247_v36 = vsel %vm240_vm11, %v245_v33, 0.0  ;;  %v256_v38 = vsel %vm249_vm12, %v254_v34, 0.0 }
 0x16d   :  { %v248_v37 = vadd.f32 %v247_v36, %v239_v35 }
 0x16f   :  { %v257_v39 = vadd.f32 %v256_v38, %v248_v37  ;;  %v263_v40 = vpop.permute.xlu1 %262 }
 0x170   :  { %v265_v41 = vsel %vm258_vm13, %v263_v40, 0.0 }
 0x171   :  { %v266_v42 = vadd.f32 %v265_v41, %v257_v39 }
 0x173   :  { %v272_v43 = vpop.permute.xlu1 %271 }
 0x174   :  { %v274_v0 = vsel %vm267_vm14, %v272_v43, 0.0 }
 0x175   :  { %v275_v44 = vadd.f32 %v274_v0, %v266_v42 }
 0x177   :  { %276 = vst [vmem:[#allocation12] sm:$0x3] %v275_v44 }
 0x178   :  { %362 = shalt.err (!%p359_p6)
}
 0x179   :  { %s363_s8 = scalar_lea.hbm %s495_s2, 32 }
 0x17a   :  { %p364_p7 = scmp.ne.s32.totalorder %s495_s2, %s363_s8  ;;  %p367_p8 = scmp.lt.u32.totalorder %s363_s8, %s495_s2 }
 0x17c   :  { %p369_p9 = pnand %p367_p8, %p364_p7 }
 0x17e   :  { %372 = shalt.err (!%p369_p9)
}
 0x17f   :  { %286 = dma.vmem_to_hbm [thread:$0]  %s284_s4, 32, %s495_s2, [#allocation9]  }
 0x180   :  { %377 = dma.done.wait [#allocation9], 32  }
 0x181   :  { %378 = vsyncadd [#allocation9], 4294967264 }
 0x182   :  { %290 = vsyncpa [#allocation8], 1 }
 0x183   :  { %291 = vsyncpa [#allocation11], 1 }
 0x184   :  { %292 = vsyncpa [#allocation9], 1 }

</bundles_post_ra>
